<compile_context>
chip_gen: v5e
topology: v5e:2x2
jax: 0.10.0
libtpu: 0.0.40
codegen_flags: <defaults>
</compile_context>

<pallas_src>
import functools

import jax
import jax.numpy as jnp
from jax.experimental import pallas as pl
from jax.experimental.pallas import tpu as pltpu


def dqn_kernel(x_ref, w1_ref, b1_ref, w2_ref, b2_ref, w3_ref, b3_ref, o_ref):
    compute_dtype = w1_ref.dtype
    x = x_ref[...]                                                    # [TB, Ip]
    h = jnp.dot(x, w1_ref[...],
                preferred_element_type=jnp.float32) + b1_ref[...]     # [TB, Hp] f32
    h = jnp.maximum(h, 0.0)
    h = jnp.dot(h.astype(compute_dtype), w2_ref[...],
                preferred_element_type=jnp.float32) + b2_ref[...]     # [TB, Hp] f32
    h = jnp.maximum(h, 0.0)
    out = jnp.dot(h.astype(compute_dtype), w3_ref[...],
                  preferred_element_type=jnp.float32) + b3_ref[...]   # [TB, Op] f32
    o_ref[...] = out.astype(o_ref.dtype)


def _round_up(n, m):
    return ((n + m - 1) // m) * m


def _pad2(a, rows, cols):
    return jnp.pad(a, ((0, rows - a.shape[0]), (0, cols - a.shape[1])))


@functools.partial(jax.jit, static_argnames=("compute_dtype", "block_b"))
def dqn_forward(x, params, *, compute_dtype=jnp.float32, block_b=256):
    w1, b1, w2, b2, w3, b3 = params
    B, I = x.shape
    H1 = w1.shape[1]
    H2 = w2.shape[1]
    O = w3.shape[1]

    LANE = 128
    Ip = _round_up(I, LANE)
    H1p = _round_up(H1, LANE)
    H2p = _round_up(H2, LANE)
    Op = _round_up(O, LANE)

    # Batch tile: multiple of 8 sublanes, capped at 256 rows (fits v7x VMEM
    # comfortably with double-buffered x/out tiles + resident weights).
    TB = min(block_b, _round_up(B, 8))
    Bp = _round_up(B, TB)

    # Lane-dense, zero-padded operands.  Weights/activations go to the MXU in
    # compute_dtype; biases stay f32 and are added post-accumulate.
    xp = _pad2(x, Bp, Ip).astype(compute_dtype)
    w1p = _pad2(w1, Ip, H1p).astype(compute_dtype)
    w2p = _pad2(w2, H1p, H2p).astype(compute_dtype)
    w3p = _pad2(w3, H2p, Op).astype(compute_dtype)
    b1p = _pad2(b1, 1, H1p).astype(jnp.float32)
    b2p = _pad2(b2, 1, H2p).astype(jnp.float32)
    b3p = _pad2(b3, 1, Op).astype(jnp.float32)

    resident = lambda a: pl.BlockSpec(a.shape, lambda i: (0, 0))

    out = pl.pallas_call(
        dqn_kernel,
        out_shape=jax.ShapeDtypeStruct((Bp, Op), jnp.float32),
        grid_spec=pl.GridSpec(
            grid=(Bp // TB,),
            in_specs=[
                pl.BlockSpec((TB, Ip), lambda i: (i, 0)),   # x: batch-tiled
                resident(w1p), resident(b1p),               # weights/biases: VMEM-resident
                resident(w2p), resident(b2p),
                resident(w3p), resident(b3p),
            ],
            out_specs=pl.BlockSpec((TB, Op), lambda i: (i, 0)),
        ),
        compiler_params=pltpu.CompilerParams(
            dimension_semantics=("parallel",),      # shard batch across TCs on v7x
            vmem_limit_bytes=32 * 1024 * 1024,      # explicit cap (v7x-safe)
        ),
    )(xp, w1p, b1p, w2p, b2p, w3p, b3p)

    return out[:B, :O]


def init_params(key, input_size, hidden_size, output_size):
    """Deterministic synthetic init (uniform like PyTorch's default Linear)."""
    ks = jax.random.split(key, 6)

    def linear(kw, kb, fan_in, fan_out):
        bound = 1.0 / jnp.sqrt(fan_in)
        w = jax.random.uniform(kw, (fan_in, fan_out), jnp.float32, -bound, bound)
        b = jax.random.uniform(kb, (1, fan_out), jnp.float32, -bound, bound)
        return w, b

    w1, b1 = linear(ks[0], ks[1], input_size, hidden_size)
    w2, b2 = linear(ks[2], ks[3], hidden_size, hidden_size)
    w3, b3 = linear(ks[4], ks[5], hidden_size, output_size)
    return (w1, b1, w2, b2, w3, b3)


def dqn_reference(x, params):
    w1, b1, w2, b2, w3, b3 = params
    h1 = jnp.maximum(x @ w1 + b1, 0.0)
    h2 = jnp.maximum(h1 @ w2 + b2, 0.0)
    return h2 @ w3 + b3


if __name__ == "__main__":
    # Small shapes consistent with a snake DQN: state vec -> hidden -> actions.
    batch, input_size, hidden_size, output_size = 8, 16, 32, 4

    key = jax.random.PRNGKey(0)
    kx, kp = jax.random.split(key)
    x = jax.random.normal(kx, (batch, input_size), jnp.float32)
    params = init_params(kp, input_size, hidden_size, output_size)

    ref = dqn_reference(x, params)

    # f32 path: exact match against the reference.
    out_f32 = jax.block_until_ready(dqn_forward(x, params, compute_dtype=jnp.float32))
    assert out_f32.shape == (batch, output_size)
    assert jnp.allclose(out_f32, ref, atol=1e-5, rtol=1e-5)

    # bf16 MXU-input path (v5e/v6e/v7x perf recommendation): f32 accumulate,
    # looser tolerance for the bf16 quantization of weights/activations.
    out_bf16 = jax.block_until_ready(dqn_forward(x, params, compute_dtype=jnp.bfloat16))
    assert out_bf16.shape == (batch, output_size)
    assert jnp.allclose(out_bf16, ref, atol=3e-2, rtol=3e-2)

    print("KERNEL_OK")
</pallas_src>

<mosaic_0001>
module attributes {stable_mosaic.version = 11 : i64} {
  func.func @dqn_kernel(%arg0: i32, %arg1: memref<8x128xf32, #tpu.memory_space<vmem>>, %arg2: memref<128x128xf32, #tpu.memory_space<vmem>>, %arg3: memref<1x128xf32, #tpu.memory_space<vmem>>, %arg4: memref<128x128xf32, #tpu.memory_space<vmem>>, %arg5: memref<1x128xf32, #tpu.memory_space<vmem>>, %arg6: memref<128x128xf32, #tpu.memory_space<vmem>>, %arg7: memref<1x128xf32, #tpu.memory_space<vmem>>, %arg8: memref<8x128xf32, #tpu.memory_space<vmem>>) attributes {dimension_semantics = [#tpu.dimension_semantics<parallel>], iteration_bounds = array<i64: 1>, scalar_prefetch = 0 : i64, scratch_operands = 0 : i64, tpu.core_type = #tpu.core_type<tc>, window_params = [{transform_indices = @transform_0, window_bounds = array<i64: 8, 128>}, {pipeline_mode = #tpu.pipeline_mode<synchronous>, transform_indices = @transform_1, window_bounds = array<i64: 128, 128>}, {pipeline_mode = #tpu.pipeline_mode<synchronous>, transform_indices = @transform_2, window_bounds = array<i64: 1, 128>}, {pipeline_mode = #tpu.pipeline_mode<synchronous>, transform_indices = @transform_3, window_bounds = array<i64: 128, 128>}, {pipeline_mode = #tpu.pipeline_mode<synchronous>, transform_indices = @transform_4, window_bounds = array<i64: 1, 128>}, {pipeline_mode = #tpu.pipeline_mode<synchronous>, transform_indices = @transform_5, window_bounds = array<i64: 128, 128>}, {pipeline_mode = #tpu.pipeline_mode<synchronous>, transform_indices = @transform_6, window_bounds = array<i64: 1, 128>}, {transform_indices = @transform_7, window_bounds = array<i64: 8, 128>}]} {
    %c0 = arith.constant 0 : index
    %c0_0 = arith.constant 0 : index
    %0 = vector.load %arg1[%c0, %c0_0] : memref<8x128xf32, #tpu.memory_space<vmem>>, vector<8x128xf32>
    %c0_1 = arith.constant 0 : index
    %c0_2 = arith.constant 0 : index
    %1 = vector.load %arg2[%c0_1, %c0_2] : memref<128x128xf32, #tpu.memory_space<vmem>>, vector<128x128xf32>
    %cst = arith.constant dense<0.000000e+00> : vector<8x128xf32>
    %2 = tpu.matmul %0, %1, %cst {dimension_numbers = #tpu.dot_dimension_numbers<[1], [0], [0], [1], [0, 0, 1, 1], [], []>} : vector<8x128xf32>, vector<128x128xf32>, vector<8x128xf32> -> vector<8x128xf32>
    %c0_3 = arith.constant 0 : index
    %c0_4 = arith.constant 0 : index
    %3 = vector.load %arg3[%c0_3, %c0_4] : memref<1x128xf32, #tpu.memory_space<vmem>>, vector<1x128xf32>
    %4 = vector.broadcast %3 : vector<1x128xf32> to vector<8x128xf32>
    %5 = arith.addf %2, %4 : vector<8x128xf32>
    %cst_5 = arith.constant 0.000000e+00 : f32
    %6 = vector.broadcast %cst_5 : f32 to vector<8x128xf32>
    %7 = arith.maximumf %5, %6 : vector<8x128xf32>
    %c0_6 = arith.constant 0 : index
    %c0_7 = arith.constant 0 : index
    %8 = vector.load %arg4[%c0_6, %c0_7] : memref<128x128xf32, #tpu.memory_space<vmem>>, vector<128x128xf32>
    %cst_8 = arith.constant dense<0.000000e+00> : vector<8x128xf32>
    %9 = tpu.matmul %7, %8, %cst_8 {dimension_numbers = #tpu.dot_dimension_numbers<[1], [0], [0], [1], [0, 0, 1, 1], [], []>} : vector<8x128xf32>, vector<128x128xf32>, vector<8x128xf32> -> vector<8x128xf32>
    %c0_9 = arith.constant 0 : index
    %c0_10 = arith.constant 0 : index
    %10 = vector.load %arg5[%c0_9, %c0_10] : memref<1x128xf32, #tpu.memory_space<vmem>>, vector<1x128xf32>
    %11 = vector.broadcast %10 : vector<1x128xf32> to vector<8x128xf32>
    %12 = arith.addf %9, %11 : vector<8x128xf32>
    %cst_11 = arith.constant 0.000000e+00 : f32
    %13 = vector.broadcast %cst_11 : f32 to vector<8x128xf32>
    %14 = arith.maximumf %12, %13 : vector<8x128xf32>
    %c0_12 = arith.constant 0 : index
    %c0_13 = arith.constant 0 : index
    %15 = vector.load %arg6[%c0_12, %c0_13] : memref<128x128xf32, #tpu.memory_space<vmem>>, vector<128x128xf32>
    %cst_14 = arith.constant dense<0.000000e+00> : vector<8x128xf32>
    %16 = tpu.matmul %14, %15, %cst_14 {dimension_numbers = #tpu.dot_dimension_numbers<[1], [0], [0], [1], [0, 0, 1, 1], [], []>} : vector<8x128xf32>, vector<128x128xf32>, vector<8x128xf32> -> vector<8x128xf32>
    %c0_15 = arith.constant 0 : index
    %c0_16 = arith.constant 0 : index
    %17 = vector.load %arg7[%c0_15, %c0_16] : memref<1x128xf32, #tpu.memory_space<vmem>>, vector<1x128xf32>
    %18 = vector.broadcast %17 : vector<1x128xf32> to vector<8x128xf32>
    %19 = arith.addf %16, %18 : vector<8x128xf32>
    %c0_17 = arith.constant 0 : index
    %c0_18 = arith.constant 0 : index
    %20 = vector.load %arg8[%c0_17, %c0_18] : memref<8x128xf32, #tpu.memory_space<vmem>>, vector<8x128xf32>
    tpu.vector_store %arg8[%c0_17, %c0_18], %19 {strides = array<i32>} : memref<8x128xf32, #tpu.memory_space<vmem>>, vector<8x128xf32>,
    return
  }
  func.func @transform_0(%arg0: i32) -> (i32, i32) {
    %c0_i32 = arith.constant 0 : i32
    %c0_i32_0 = arith.constant 0 : i32
    return %arg0, %c0_i32 : i32, i32
  }
  func.func @transform_1(%arg0: i32) -> (i32, i32) {
    %c0_i32 = arith.constant 0 : i32
    %c0_i32_0 = arith.constant 0 : i32
    %c0_i32_1 = arith.constant 0 : i32
    return %c0_i32, %c0_i32_0 : i32, i32
  }
  func.func @transform_2(%arg0: i32) -> (i32, i32) {
    %c0_i32 = arith.constant 0 : i32
    %c0_i32_0 = arith.constant 0 : i32
    %c0_i32_1 = arith.constant 0 : i32
    return %c0_i32, %c0_i32_0 : i32, i32
  }
  func.func @transform_3(%arg0: i32) -> (i32, i32) {
    %c0_i32 = arith.constant 0 : i32
    %c0_i32_0 = arith.constant 0 : i32
    %c0_i32_1 = arith.constant 0 : i32
    return %c0_i32, %c0_i32_0 : i32, i32
  }
  func.func @transform_4(%arg0: i32) -> (i32, i32) {
    %c0_i32 = arith.constant 0 : i32
    %c0_i32_0 = arith.constant 0 : i32
    %c0_i32_1 = arith.constant 0 : i32
    return %c0_i32, %c0_i32_0 : i32, i32
  }
  func.func @transform_5(%arg0: i32) -> (i32, i32) {
    %c0_i32 = arith.constant 0 : i32
    %c0_i32_0 = arith.constant 0 : i32
    %c0_i32_1 = arith.constant 0 : i32
    return %c0_i32, %c0_i32_0 : i32, i32
  }
  func.func @transform_6(%arg0: i32) -> (i32, i32) {
    %c0_i32 = arith.constant 0 : i32
    %c0_i32_0 = arith.constant 0 : i32
    %c0_i32_1 = arith.constant 0 : i32
    return %c0_i32, %c0_i32_0 : i32, i32
  }
  func.func @transform_7(%arg0: i32) -> (i32, i32) {
    %c0_i32 = arith.constant 0 : i32
    %c0_i32_0 = arith.constant 0 : i32
    return %arg0, %c0_i32 : i32, i32
  }
}

</mosaic_0001>

<bundles_post_ra>
// kernel: dqn_forward.1
= control target key start
LH: loop header
LB: loop body
LE: loop exit
PB: predicated region body
PF: predicated region fallthrough
CT: control target
= control target key end

     0   :  { %s356_s1 = inlined_call_operand.vmem [shape: f32[128,128], index: 1, kind: input, shape index: {}]   ;;  %s357_s3 = inlined_call_operand.vmem [shape: f32[128,128], index: 3, kind: input, shape index: {}]   ;;  %s358_s2 = inlined_call_operand.vmem [shape: f32[1,128], index: 2, kind: input, shape index: {}]   ;;  %s359_s0 = inlined_call_operand.vmem [shape: f32[8,128], index: 0, kind: input, shape index: {}]   ;;  %s360_s4 = inlined_call_operand.vmem [shape: f32[1,128], index: 4, kind: input, shape index: {}]   ;;  %s361_s5 = inlined_call_operand.vmem [shape: f32[128,128], index: 5, kind: input, shape index: {}]   ;;  %s362_s6 = inlined_call_operand.vmem [shape: f32[1,128], index: 6, kind: input, shape index: {}]   ;;  %s363_s7 = inlined_call_operand.vmem [shape: f32[8,128], index: 7, kind: output, shape index: {}]  }
   0x1   :  { %v42_v0 = vld [vmem:[%s356_s1 + $0x78] sm:$0xff]  ;;  %v41_v1 = vld [vmem:[%s356_s1 + $0x70] sm:$0xff]  ;;  %v40_v2 = vld [vmem:[%s356_s1 + $0x68] sm:$0xff] }
   0x2   :  { %47 = vmatpush.msra.mxu0 %v42_v0  ;;  %v39_v3 = vld [vmem:[%s356_s1 + $0x60] sm:$0xff]  ;;  %v83_v4 = vld [vmem:[%s357_s3 + $0x78] sm:$0xff]  ;;  %v82_v6 = vld [vmem:[%s357_s3 + $0x70] sm:$0xff] }
   0x3   :  { %v38_v5 = vld [vmem:[%s356_s1 + $0x58] sm:$0xff]  ;;  %88 = vmatpush.msra.mxu1 %v83_v4  ;;  %v81_v7 = vld [vmem:[%s357_s3 + $0x68] sm:$0xff]  ;;  %v37_v8 = vld [vmem:[%s356_s1 + $0x50] sm:$0xff] }
   0x4   :  { %48 = vmatpush.msra.mxu0 %v41_v1  ;;  %v80_v9 = vld [vmem:[%s357_s3 + $0x60] sm:$0xff]  ;;  %v36_v10 = vld [vmem:[%s356_s1 + $0x48] sm:$0xff]  ;;  %v79_v11 = vld [vmem:[%s357_s3 + $0x58] sm:$0xff] }
   0x5   :  { %89 = vmatpush.msra.mxu1 %v82_v6  ;;  %v35_v12 = vld [vmem:[%s356_s1 + $0x40] sm:$0xff]  ;;  %v78_v13 = vld [vmem:[%s357_s3 + $0x50] sm:$0xff]  ;;  %v34_v14 = vld [vmem:[%s356_s1 + $0x38] sm:$0xff] }
   0x6   :  { %49 = vmatpush.msra.mxu0 %v40_v2  ;;  %v77_v15 = vld [vmem:[%s357_s3 + $0x48] sm:$0xff]  ;;  %v33_v16 = vld [vmem:[%s356_s1 + $0x30] sm:$0xff]  ;;  %v76_v17 = vld [vmem:[%s357_s3 + $0x40] sm:$0xff] }
   0x7   :  { %90 = vmatpush.msra.mxu1 %v81_v7  ;;  %v32_v18 = vld [vmem:[%s356_s1 + $0x28] sm:$0xff]  ;;  %v75_v19 = vld [vmem:[%s357_s3 + $0x38] sm:$0xff]  ;;  %v31_v20 = vld [vmem:[%s356_s1 + $0x20] sm:$0xff] }
   0x8   :  { %50 = vmatpush.msra.mxu0 %v39_v3  ;;  %v74_v21 = vld [vmem:[%s357_s3 + $0x30] sm:$0xff]  ;;  %v30_v22 = vld [vmem:[%s356_s1 + $0x18] sm:$0xff]  ;;  %v73_v23 = vld [vmem:[%s357_s3 + $0x28] sm:$0xff] }
   0x9   :  { %91 = vmatpush.msra.mxu1 %v80_v9  ;;  %v29_v24 = vld [vmem:[%s356_s1 + $0x10] sm:$0xff]  ;;  %v72_v25 = vld [vmem:[%s357_s3 + $0x20] sm:$0xff]  ;;  %v28_v26 = vld [vmem:[%s356_s1 + $0x8] sm:$0xff] }
   0xa   :  { %51 = vmatpush.msra.mxu0 %v38_v5  ;;  %v71_v27 = vld [vmem:[%s357_s3 + $0x18] sm:$0xff]  ;;  %v27_v28 = vld [vmem:[%s356_s1] sm:$0xff]  ;;  %v70_v30 = vld [vmem:[%s357_s3 + $0x10] sm:$0xff] }
   0xb   :  { %92 = vmatpush.msra.mxu1 %v79_v11  ;;  %v26_v29 = vld [vmem:[%s359_s0] sm:$0xff]  ;;  %v69_v31 = vld [vmem:[%s357_s3 + $0x8] sm:$0xff]  ;;  %v124_v33 = vld [vmem:[%s361_s5 + $0x78] sm:$0xff] }
   0xc   :  { %52 = vmatpush.msra.mxu0 %v37_v8  ;;  %v68_v32 = vld [vmem:[%s357_s3] sm:$0xff]  ;;  %v123_v34 = vld [vmem:[%s361_s5 + $0x70] sm:$0xff]  ;;  %129 = vmatpush.msra.mxu2 %v124_v33  ;;  %v122_v35 = vld [vmem:[%s361_s5 + $0x68] sm:$0xff] }
   0xd   :  { %93 = vmatpush.msra.mxu1 %v78_v13  ;;  %v121_v36 = vld [vmem:[%s361_s5 + $0x60] sm:$0xff]  ;;  %v120_v37 = vld [vmem:[%s361_s5 + $0x58] sm:$0xff]  ;;  %v119_v38 = vld [vmem:[%s361_s5 + $0x50] sm:$0xff] }
   0xe   :  { %53 = vmatpush.msra.mxu0 %v36_v10  ;;  %130 = vmatpush.msra.mxu2 %v123_v34  ;;  %v118_v39 = vld [vmem:[%s361_s5 + $0x48] sm:$0xff]  ;;  %v117_v40 = vld [vmem:[%s361_s5 + $0x40] sm:$0xff]  ;;  %v116_v41 = vld [vmem:[%s361_s5 + $0x38] sm:$0xff] }
   0xf   :  { %94 = vmatpush.msra.mxu1 %v77_v15  ;;  %v115_v42 = vld [vmem:[%s361_s5 + $0x30] sm:$0xff]  ;;  %v114_v43 = vld [vmem:[%s361_s5 + $0x28] sm:$0xff]  ;;  %v113_v44 = vld [vmem:[%s361_s5 + $0x20] sm:$0xff] }
  0x10   :  { %54 = vmatpush.msra.mxu0 %v35_v12  ;;  %131 = vmatpush.msra.mxu2 %v122_v35  ;;  %v112_v45 = vld [vmem:[%s361_s5 + $0x18] sm:$0xff]  ;;  %v154_v46 = vld [vmem:[%s358_s2] ss:$0 sm:$0xff]  ;;  %v111_v50 = vld [vmem:[%s361_s5 + $0x10] sm:$0xff] }
  0x11   :  { %95 = vmatpush.msra.mxu1 %v76_v17  ;;  %v110_v51 = vld [vmem:[%s361_s5 + $0x8] sm:$0xff]  ;;  %v109_v52 = vld [vmem:[%s361_s5] sm:$0xff] }
  0x12   :  { %55 = vmatpush.msra.mxu0 %v34_v14  ;;  %132 = vmatpush.msra.mxu2 %v121_v36  ;;  %v155_v53 = vld [vmem:[%s360_s4] ss:$0 sm:$0xff] }
  0x13   :  { %96 = vmatpush.msra.mxu1 %v75_v19  ;;  %v156_v57 = vld [vmem:[%s362_s6] ss:$0 sm:$0xff] }
  0x14   :  { %56 = vmatpush.msra.mxu0 %v33_v16  ;;  %133 = vmatpush.msra.mxu2 %v120_v37 }
  0x15   :  { %97 = vmatpush.msra.mxu1 %v74_v21 }
  0x16   :  { %57 = vmatpush.msra.mxu0 %v32_v18  ;;  %134 = vmatpush.msra.mxu2 %v119_v38 }
  0x17   :  { %98 = vmatpush.msra.mxu1 %v73_v23 }
  0x18   :  { %58 = vmatpush.msra.mxu0 %v31_v20  ;;  %135 = vmatpush.msra.mxu2 %v118_v39 }
  0x19   :  { %99 = vmatpush.msra.mxu1 %v72_v25 }
  0x1a   :  { %59 = vmatpush.msra.mxu0 %v30_v22  ;;  %136 = vmatpush.msra.mxu2 %v117_v40 }
  0x1b   :  { %100 = vmatpush.msra.mxu1 %v71_v27 }
  0x1c   :  { %60 = vmatpush.msra.mxu0 %v29_v24  ;;  %137 = vmatpush.msra.mxu2 %v116_v41 }
  0x1d   :  { %101 = vmatpush.msra.mxu1 %v70_v30 }
  0x1e   :  { %61 = vmatpush.msra.mxu0 %v28_v26  ;;  %138 = vmatpush.msra.mxu2 %v115_v42 }
  0x1f   :  { %102 = vmatpush.msra.mxu1 %v69_v31 }
  0x20   :  { %62 = vmatpush.msra.mxu0 %v27_v28  ;;  %139 = vmatpush.msra.mxu2 %v114_v43 }
  0x21   :  { %63 = vmatmul.f32.vlgmr.msra.gmra.mxu0 %v26_v29  ;;  %103 = vmatpush.msra.mxu1 %v68_v32 }
  0x22   :  { %140 = vmatpush.msra.mxu2 %v113_v44 }
  0x24   :  { %141 = vmatpush.msra.mxu2 %v112_v45 }
  0x26   :  { %142 = vmatpush.msra.mxu2 %v111_v50 }
  0x28   :  { %143 = vmatpush.msra.mxu2 %v110_v51 }
  0x2a   :  { %144 = vmatpush.msra.mxu2 %v109_v52 }
  0x9e   :  { %v64_v47 = vpop.f32.mrf.mxu0 }
  0x9f   :  { %v65_v48 = vadd.f32 %v154_v46, %v64_v47 }
  0xa1   :  { %v67_v49 = vmax.f32 %v65_v48, 0.0 }
  0xa3   :  { %104 = vmatmul.f32.vlgmr.msra.gmra.mxu1 %v67_v49 }
 0x120   :  { %v105_v54 = vpop.f32.mrf.mxu1 }
 0x121   :  { %v106_v55 = vadd.f32 %v155_v53, %v105_v54 }
 0x123   :  { %v108_v56 = vmax.f32 %v106_v55, 0.0 }
 0x125   :  { %145 = vmatmul.f32.vlgmr.msra.gmra.mxu2 %v108_v56 }
 0x1a8   :  { %v146_v58 = vpop.f32.mrf.mxu2 }
 0x1a9   :  { %v147_v59 = vadd.f32 %v156_v57, %v146_v58 }
 0x1ab   :  { %149 = vst [vmem:[%s363_s7] sm:$0xff] %v147_v59 }

</bundles_post_ra>
